<compile_context>
chip_gen: v7x
topology: tpu7x:2x2x1
jax: 0.10.0
libtpu: 0.0.40
codegen_flags: <defaults>
</compile_context>

<pallas_src>
import jax
import jax.numpy as jnp
import numpy as np
from jax.experimental import pallas as pl
from jax.experimental.pallas import tpu as pltpu

# ---- StructureDiffuser hyperparameters (defaults from __init__) ----
BETA_1 = 1e-4
BETA_T = 0.02
T_STEPS = 1000
ALPHA_GAP = 1e-8
ALPHA_1 = 1.0 - BETA_1
ALPHA_T = 1.0 - BETA_T


def _schedule_tables():
    """Constant (T,) tables for the element-independent part of the linspace
    schedule: cumulative product cp and cumulative reciprocal sum hh."""
    i = jnp.arange(T_STEPS, dtype=jnp.float32)
    start0 = jnp.float32(ALPHA_1 - ALPHA_GAP)
    stop0 = jnp.float32(ALPHA_T - ALPHA_GAP)
    c = start0 + (stop0 - start0) * (i / (T_STEPS - 1))
    cp = jnp.cumprod(c)
    hh = jnp.cumsum(1.0 / c)
    return cp, hh


def _pick_tile_b(B, C, HW, vmem_budget_bytes=12 << 20):
    """Samples per grid step: as large as the (conservative, v7x-safe) VMEM
    budget allows, dividing B, and keeping >=2 grid steps when B >= 2 so the
    parallel batch axis can shard across v7x's 2 TensorCores."""
    per_sample = 2 * 4 * C * HW * 4      # 4 f32 arrays, double-buffered
    cap = max(1, vmem_budget_bytes // per_sample)
    if B >= 2:
        cap = min(cap, B // 2)
    tb = 1
    for d in range(1, min(cap, B) + 1):
        if B % d == 0:
            tb = d
    return tb


def _make_kernel(TB, HW, HID):
    def kernel(x0_ref, s_ref, n_ref,        # (C, TB*HW) activation tiles
               a_ref, g_ref,                # (1, TB*HW) per-column schedule rows
               temb_ref,                    # (TB, HID, 1) time embedding (+b1)
               w1_ref, w2_ref, b2_ref,      # resident weights
               loss_ref):                   # (C, TB*HW) output
        x0 = x0_ref[...].astype(jnp.float32)
        s = s_ref[...].astype(jnp.float32)
        noise = n_ref[...].astype(jnp.float32)

        # linspace_cumprod_cover, first order in ALPHA_GAP (see header):
        #   alphas_bar = A_b + G_b * struct   (A_b, G_b per-sample, per-column)
        alphas_bar = a_ref[...] + g_ref[...] * s            # (C, TB*HW)

        # diffuse: x_t = sqrt(ab)*x0 + sqrt(1-ab)*noise  (sqrt on EUP, free slot)
        x_t = jnp.sqrt(alphas_bar) * x0 + jnp.sqrt(1.0 - alphas_bar) * noise

        # model: per-pixel MLP, one MXU dot per layer across all TB samples.
        h = jnp.dot(w1_ref[...], x_t, preferred_element_type=jnp.float32)
        if TB == 1:
            h = h + temb_ref[0]                              # (HID,1) lane bcast
        else:
            temb_cols = jnp.concatenate(
                [jnp.broadcast_to(temb_ref[b], (HID, HW)) for b in range(TB)],
                axis=1)                                      # (HID, TB*HW)
            h = h + temb_cols
        h = jnp.maximum(h, 0.0)
        pred = jnp.dot(w2_ref[...], h, preferred_element_type=jnp.float32)
        pred = pred + b2_ref[...]                            # (C,1) lane bcast

        # F.mse_loss(pred, noise, reduction='none')
        diff = pred - noise
        loss_ref[...] = (diff * diff).astype(loss_ref.dtype)

    return kernel


def structure_diffuser_forward(x_0, struct, t, noise, params):
    """x_0, struct, noise: NCHW [B, C, H, W]; t: int32 [B]. Returns loss NCHW."""
    B, C, H, W = x_0.shape
    HW = H * W
    w1t, b1, w2t, b2, freqs = params
    HID = w1t.shape[0]

    TB = _pick_tile_b(B, C, HW)
    n_blocks = B // TB

    # ---- per-sample scalar precomputation (tiny; review items) ----
    t = jnp.clip(t.astype(jnp.int32), 0, T_STEPS - 1)        # safe table indexing
    cp, hh = _schedule_tables()
    cp_t = cp[t]                                              # (B,)
    hh_t = hh[t]                                              # (B,)

    s3 = struct.reshape(B, C, HW)
    s_min = jnp.min(s3, axis=(1, 2)).astype(jnp.float32)      # te.map_ranges stats
    s_max = jnp.max(s3, axis=(1, 2)).astype(jnp.float32)
    denom = jnp.where(s_max > s_min, s_max - s_min, 1.0)

    g_b = cp_t * ALPHA_GAP * hh_t / denom                     # alphas_bar = A + G*s
    a_b = cp_t - g_b * s_min
    a_col = jnp.repeat(a_b, HW).reshape(1, B * HW).astype(jnp.float32)
    g_col = jnp.repeat(g_b, HW).reshape(1, B * HW).astype(jnp.float32)

    # sinusoidal time embedding, b1 folded in: (B, HID, 1)
    temb = jnp.sin(t.astype(jnp.float32)[None, :] * freqs) + b1     # (HID, B)
    temb_b = jnp.transpose(temb).reshape(B, HID, 1).astype(jnp.float32)

    # ---- channels-major, lane-folded activation layout (C, B*HW) ----
    def to_cb(arr):
        return arr.reshape(B, C, HW).transpose(1, 0, 2).reshape(C, B * HW)

    x_cb = to_cb(x_0)            # native dtype; cast to f32 inside the kernel
    s_cb = to_cb(struct)
    n_cb = to_cb(noise)

    act_spec = pl.BlockSpec((C, TB * HW), lambda i: (0, i))
    row_spec = pl.BlockSpec((1, TB * HW), lambda i: (0, i))
    temb_spec = pl.BlockSpec((TB, HID, 1), lambda i: (i, 0, 0))

    def resident(shape):
        zeros = (0,) * len(shape)
        return pl.BlockSpec(shape, lambda i: zeros)          # weights stay in VMEM

    loss_cb = pl.pallas_call(
        _make_kernel(TB, HW, HID),
        out_shape=jax.ShapeDtypeStruct((C, B * HW), x_0.dtype),
        grid_spec=pltpu.PrefetchScalarGridSpec(
            num_scalar_prefetch=0,
            grid=(n_blocks,),
            in_specs=[act_spec, act_spec, act_spec,          # x_0, struct, noise
                      row_spec, row_spec,                    # A_col, G_col
                      temb_spec,                             # temb (+b1)
                      resident((HID, C)), resident((C, HID)), resident((C, 1))],
            out_specs=act_spec,
        ),
        compiler_params=pltpu.CompilerParams(
            dimension_semantics=("parallel",)),               # batch independent
    )(x_cb, s_cb, n_cb, a_col, g_col, temb_b, w1t, w2t, b2)

    return loss_cb.reshape(C, B, HW).transpose(1, 0, 2).reshape(B, C, H, W)


def reference_forward(x_0, struct, t, noise, params):
    """Pure-JAX reference of the same semantics (for validation)."""
    B, C, H, W = x_0.shape
    s = struct.astype(jnp.float32)
    s_min = jnp.min(s, axis=(1, 2, 3), keepdims=True)
    s_max = jnp.max(s, axis=(1, 2, 3), keepdims=True)
    denom = jnp.where(s_max > s_min, s_max - s_min, 1.0)
    norm = (s - s_min) / denom
    start = (ALPHA_1 - ALPHA_GAP) + norm * ALPHA_GAP
    stop = (ALPHA_T - ALPHA_GAP) + norm * ALPHA_GAP

    i = jnp.arange(T_STEPS, dtype=jnp.float32)
    alphas = start[..., None] + (stop - start)[..., None] * (i / (T_STEPS - 1))
    mask = i <= t[:, None, None, None, None].astype(jnp.float32)
    alphas_bar = jnp.prod(jnp.where(mask, alphas, 1.0), axis=-1)

    x_t = jnp.sqrt(alphas_bar) * x_0 + jnp.sqrt(1.0 - alphas_bar) * noise

    w1t, b1, w2t, b2, freqs = params
    xt_flat = x_t.reshape(B, C, H * W)
    h = jnp.einsum("hc,bcp->bhp", w1t, xt_flat) + b1[None]
    temb = jnp.sin(t.astype(jnp.float32)[:, None, None] * freqs[None])
    h = jnp.maximum(h + temb, 0.0)
    pred = jnp.einsum("ch,bhp->bcp", w2t, h) + b2[None]
    return (pred.reshape(B, C, H, W) - noise) ** 2


if __name__ == "__main__":
    key = jax.random.PRNGKey(0)
    B, C, H, W = 2, 4, 16, 16
    HID = 32

    k_x, k_s, k_t, k_n, k_p = jax.random.split(key, 5)
    x_0 = jax.random.normal(k_x, (B, C, H, W), jnp.float32)
    struct = jax.random.uniform(k_s, (B, C, H, W), jnp.float32)
    # forward() samples these internally (torch.randint / torch.randn);
    # sampled deterministically here.
    t = jax.random.randint(k_t, (B,), 0, T_STEPS)
    noise = jax.random.normal(k_n, (B, C, H, W), jnp.float32)

    # Deterministic model parameters (synthetic 2-layer per-pixel MLP).
    k_w1, k_w2 = jax.random.split(k_p, 2)
    w1t = 0.3 * jax.random.normal(k_w1, (HID, C), jnp.float32)
    b1 = jnp.zeros((HID, 1), jnp.float32)
    w2t = 0.3 * jax.random.normal(k_w2, (C, HID), jnp.float32)
    b2 = jnp.zeros((C, 1), jnp.float32)
    freqs = (jnp.exp(-4.0 * jnp.arange(HID, dtype=jnp.float32) / HID)
             .reshape(HID, 1) * (2.0 * np.pi / T_STEPS))
    params = (w1t, b1, w2t, b2, freqs)

    loss = structure_diffuser_forward(x_0, struct, t, noise, params)
    loss = jax.block_until_ready(loss)

    ref = reference_forward(x_0, struct, t, noise, params)
    np.testing.assert_allclose(np.asarray(loss), np.asarray(ref),
                               rtol=2e-3, atol=1e-4)
    print("KERNEL_OK")
</pallas_src>

<mosaic_0001>
module attributes {stable_mosaic.version = 11 : i64} {
  func.func @kernel(%arg0: i32, %arg1: memref<4x256xf32, #tpu.memory_space<vmem>>, %arg2: memref<4x256xf32, #tpu.memory_space<vmem>>, %arg3: memref<4x256xf32, #tpu.memory_space<vmem>>, %arg4: memref<1x256xf32, #tpu.memory_space<vmem>>, %arg5: memref<1x256xf32, #tpu.memory_space<vmem>>, %arg6: memref<1x32x1xf32, #tpu.memory_space<vmem>>, %arg7: memref<32x4xf32, #tpu.memory_space<vmem>>, %arg8: memref<4x32xf32, #tpu.memory_space<vmem>>, %arg9: memref<4x1xf32, #tpu.memory_space<vmem>>, %arg10: memref<4x256xf32, #tpu.memory_space<vmem>>) attributes {dimension_semantics = [#tpu.dimension_semantics<parallel>], iteration_bounds = array<i64: 2>, scalar_prefetch = 0 : i64, scratch_operands = 0 : i64, tpu.core_type = #tpu.core_type<tc>, window_params = [{transform_indices = @transform_0, window_bounds = array<i64: 4, 256>}, {transform_indices = @transform_1, window_bounds = array<i64: 4, 256>}, {transform_indices = @transform_2, window_bounds = array<i64: 4, 256>}, {transform_indices = @transform_3, window_bounds = array<i64: 1, 256>}, {transform_indices = @transform_4, window_bounds = array<i64: 1, 256>}, {transform_indices = @transform_5, window_bounds = array<i64: 1, 32, 1>}, {pipeline_mode = #tpu.pipeline_mode<synchronous>, transform_indices = @transform_6, window_bounds = array<i64: 32, 4>}, {pipeline_mode = #tpu.pipeline_mode<synchronous>, transform_indices = @transform_7, window_bounds = array<i64: 4, 32>}, {pipeline_mode = #tpu.pipeline_mode<synchronous>, transform_indices = @transform_8, window_bounds = array<i64: 4, 1>}, {transform_indices = @transform_9, window_bounds = array<i64: 4, 256>}]} {
    %c0 = arith.constant 0 : index
    %c0_0 = arith.constant 0 : index
    %0 = vector.load %arg1[%c0, %c0_0] : memref<4x256xf32, #tpu.memory_space<vmem>>, vector<4x256xf32>
    %c0_1 = arith.constant 0 : index
    %c0_2 = arith.constant 0 : index
    %1 = vector.load %arg2[%c0_1, %c0_2] : memref<4x256xf32, #tpu.memory_space<vmem>>, vector<4x256xf32>
    %c0_3 = arith.constant 0 : index
    %c0_4 = arith.constant 0 : index
    %2 = vector.load %arg3[%c0_3, %c0_4] : memref<4x256xf32, #tpu.memory_space<vmem>>, vector<4x256xf32>
    %c0_5 = arith.constant 0 : index
    %c0_6 = arith.constant 0 : index
    %3 = vector.load %arg4[%c0_5, %c0_6] : memref<1x256xf32, #tpu.memory_space<vmem>>, vector<1x256xf32>
    %c0_7 = arith.constant 0 : index
    %c0_8 = arith.constant 0 : index
    %4 = vector.load %arg5[%c0_7, %c0_8] : memref<1x256xf32, #tpu.memory_space<vmem>>, vector<1x256xf32>
    %5 = vector.broadcast %4 : vector<1x256xf32> to vector<4x256xf32>
    %6 = arith.mulf %5, %1 : vector<4x256xf32>
    %7 = vector.broadcast %3 : vector<1x256xf32> to vector<4x256xf32>
    %8 = arith.addf %7, %6 : vector<4x256xf32>
    %9 = math.sqrt %8 : vector<4x256xf32>
    %10 = arith.mulf %9, %0 : vector<4x256xf32>
    %cst = arith.constant 1.000000e+00 : f32
    %11 = vector.broadcast %cst : f32 to vector<4x256xf32>
    %12 = arith.subf %11, %8 : vector<4x256xf32>
    %13 = math.sqrt %12 : vector<4x256xf32>
    %14 = arith.mulf %13, %2 : vector<4x256xf32>
    %15 = arith.addf %10, %14 : vector<4x256xf32>
    %c0_9 = arith.constant 0 : index
    %c0_10 = arith.constant 0 : index
    %16 = vector.load %arg7[%c0_9, %c0_10] : memref<32x4xf32, #tpu.memory_space<vmem>>, vector<32x4xf32>
    %cst_11 = arith.constant dense<0.000000e+00> : vector<32x256xf32>
    %17 = tpu.matmul %16, %15, %cst_11 {dimension_numbers = #tpu.dot_dimension_numbers<[1], [0], [0], [1], [0, 0, 1, 1], [], []>} : vector<32x4xf32>, vector<4x256xf32>, vector<32x256xf32> -> vector<32x256xf32>
    %c0_12 = arith.constant 0 : index
    %c0_13 = arith.constant 0 : index
    %c0_14 = arith.constant 0 : index
    %18 = vector.load %arg6[%c0_12, %c0_13, %c0_14] : memref<1x32x1xf32, #tpu.memory_space<vmem>>, vector<1x32x1xf32>
    %19 = vector.shape_cast %18 : vector<1x32x1xf32> to vector<32x1xf32>
    %20 = vector.broadcast %19 : vector<32x1xf32> to vector<32x256xf32>
    %21 = arith.addf %17, %20 : vector<32x256xf32>
    %cst_15 = arith.constant 0.000000e+00 : f32
    %22 = vector.broadcast %cst_15 : f32 to vector<32x256xf32>
    %23 = arith.maximumf %21, %22 : vector<32x256xf32>
    %c0_16 = arith.constant 0 : index
    %c0_17 = arith.constant 0 : index
    %24 = vector.load %arg8[%c0_16, %c0_17] : memref<4x32xf32, #tpu.memory_space<vmem>>, vector<4x32xf32>
    %cst_18 = arith.constant dense<0.000000e+00> : vector<4x256xf32>
    %25 = tpu.matmul %24, %23, %cst_18 {dimension_numbers = #tpu.dot_dimension_numbers<[1], [0], [0], [1], [0, 0, 1, 1], [], []>} : vector<4x32xf32>, vector<32x256xf32>, vector<4x256xf32> -> vector<4x256xf32>
    %c0_19 = arith.constant 0 : index
    %c0_20 = arith.constant 0 : index
    %26 = vector.load %arg9[%c0_19, %c0_20] : memref<4x1xf32, #tpu.memory_space<vmem>>, vector<4x1xf32>
    %27 = vector.broadcast %26 : vector<4x1xf32> to vector<4x256xf32>
    %28 = arith.addf %25, %27 : vector<4x256xf32>
    %29 = arith.subf %28, %2 : vector<4x256xf32>
    %30 = arith.mulf %29, %29 : vector<4x256xf32>
    %c0_21 = arith.constant 0 : index
    %c0_22 = arith.constant 0 : index
    %31 = vector.load %arg10[%c0_21, %c0_22] : memref<4x256xf32, #tpu.memory_space<vmem>>, vector<4x256xf32>
    tpu.vector_store %arg10[%c0_21, %c0_22], %30 {strides = array<i32>} : memref<4x256xf32, #tpu.memory_space<vmem>>, vector<4x256xf32>,
    return
  }
  func.func @transform_0(%arg0: i32) -> (i32, i32) {
    %c0_i32 = arith.constant 0 : i32
    %c0_i32_0 = arith.constant 0 : i32
    return %c0_i32, %arg0 : i32, i32
  }
  func.func @transform_1(%arg0: i32) -> (i32, i32) {
    %c0_i32 = arith.constant 0 : i32
    %c0_i32_0 = arith.constant 0 : i32
    return %c0_i32, %arg0 : i32, i32
  }
  func.func @transform_2(%arg0: i32) -> (i32, i32) {
    %c0_i32 = arith.constant 0 : i32
    %c0_i32_0 = arith.constant 0 : i32
    return %c0_i32, %arg0 : i32, i32
  }
  func.func @transform_3(%arg0: i32) -> (i32, i32) {
    %c0_i32 = arith.constant 0 : i32
    %c0_i32_0 = arith.constant 0 : i32
    return %c0_i32, %arg0 : i32, i32
  }
  func.func @transform_4(%arg0: i32) -> (i32, i32) {
    %c0_i32 = arith.constant 0 : i32
    %c0_i32_0 = arith.constant 0 : i32
    return %c0_i32, %arg0 : i32, i32
  }
  func.func @transform_5(%arg0: i32) -> (i32, i32, i32) {
    %c0_i32 = arith.constant 0 : i32
    %c0_i32_0 = arith.constant 0 : i32
    %c0_i32_1 = arith.constant 0 : i32
    return %arg0, %c0_i32, %c0_i32_0 : i32, i32, i32
  }
  func.func @transform_6(%arg0: i32) -> (i32, i32) {
    %c0_i32 = arith.constant 0 : i32
    %c0_i32_0 = arith.constant 0 : i32
    %c0_i32_1 = arith.constant 0 : i32
    return %c0_i32, %c0_i32_0 : i32, i32
  }
  func.func @transform_7(%arg0: i32) -> (i32, i32) {
    %c0_i32 = arith.constant 0 : i32
    %c0_i32_0 = arith.constant 0 : i32
    %c0_i32_1 = arith.constant 0 : i32
    return %c0_i32, %c0_i32_0 : i32, i32
  }
  func.func @transform_8(%arg0: i32) -> (i32, i32) {
    %c0_i32 = arith.constant 0 : i32
    %c0_i32_0 = arith.constant 0 : i32
    %c0_i32_1 = arith.constant 0 : i32
    return %c0_i32, %c0_i32_0 : i32, i32
  }
  func.func @transform_9(%arg0: i32) -> (i32, i32) {
    %c0_i32 = arith.constant 0 : i32
    %c0_i32_0 = arith.constant 0 : i32
    return %c0_i32, %arg0 : i32, i32
  }
}

</mosaic_0001>

<bundles_post_ra>
// kernel: tpu_custom_call.1
= control target key start
LH: loop header
LB: loop body
LE: loop exit
PB: predicated region body
PF: predicated region fallthrough
CT: control target
= control target key end

     0   :  { %s1239_s0 = inlined_call_operand.vmem [shape: f32[4,512], index: 0, kind: input, shape index: {}]   ;;  %s1240_s1 = inlined_call_operand.vmem [shape: f32[4,512], index: 1, kind: input, shape index: {}]   ;;  %s1241_s2 = inlined_call_operand.vmem [shape: f32[4,512], index: 2, kind: input, shape index: {}]   ;;  %s1242_s3 = inlined_call_operand.vmem [shape: f32[1,512], index: 3, kind: input, shape index: {}]   ;;  %s1243_s4 = inlined_call_operand.vmem [shape: f32[1,512], index: 4, kind: input, shape index: {}]   ;;  %s1244_s5 = inlined_call_operand.vmem [shape: f32[2,32,1], index: 5, kind: input, shape index: {}]   ;;  %s1245_s6 = inlined_call_operand.vmem [shape: f32[32,4], index: 6, kind: input, shape index: {}]   ;;  %s1246_s7 = inlined_call_operand.vmem [shape: f32[4,32], index: 7, kind: input, shape index: {}]   ;;  %s1247_s8 = inlined_call_operand.vmem [shape: f32[4,1], index: 8, kind: input, shape index: {}]   ;;  %s1248_s9 = inlined_call_operand.hbm [shape: f32[4,512], index: 9, kind: output, shape index: {}]  }
   0x1   :  { %1249 = sst [smem:[#allocation6_spill]] %s1242_s3 }
   0x2   :  { %14 = vsyncpa [#allocation3], 0 }
   0x3   :  { %16 = vsyncpa [#allocation3 + $0x1], 0  ;;  %s1084_s30 = smov 0   ;;  %s1086_s10 = smov 0  }
   0x4   :  { %s1088_s11 = smov 0   ;;  %s1090_s12 = smov 0  }
   0x5 LB: > { %s1105_s13 = sadd.s32 4294967295, %s1029_s12   ;;  %s876_s14 = sadd.s32 4294967294, %s1029_s12   ;;  %s1029_s12 = sphi %s1090_s12, %s1258_s12   ;;  %s1025_s11 = sphi %s1088_s11, %s1257_s11   ;;  %s1021_s10 = sphi %s1086_s10, %s1256_s10   ;;  %s1017_s30 = sphi %s1084_s30, %s1255_s30  }
   0x6   : > { %s1109_s15 = sadd.s32 1, %s1029_s12   ;;  %s248_s16 = sadd.s32 1, %s1025_s11 }
   0x7   : > { %s245_s17 = ssub.s32 %s1029_s12, %s1109_s15  ;;  %p258_p0 = scmp.ne.s32.totalorder %s1025_s11, %s1021_s10 }
   0x8   : > { %p246_p1 = scmp.eq.s32.totalorder %s245_s17, 0  ;;  %p259_p2 = scmp.eq.s32.totalorder %s1105_s13, 1 }
   0x9   : > { %p264_p3 = scmp.ne.s32.totalorder %s1021_s10, %s1017_s30  ;;  %p265_p4 = scmp.eq.s32.totalorder %s876_s14, 1 }
   0xa   : > { %s1120_s18 = scalar_select %p246_p1, %s1025_s11, %s248_s16  }
   0xb   : > { %p1122_p5 = por %p259_p2, %p258_p0  ;;  %p1126_p6 = por %p265_p4, %p264_p3 }
   0xc   : > { %1250 = sst [smem:[#allocation5_spill]] %s1120_s18  ;;  %p879_p7 = scmp.ge.s32.totalorder %s1029_s12, 1 }
   0xd   : > { %p343_p8 = scmp.lt.s32.totalorder %s1029_s12, 3 }
   0xf   : > { %p344_p9 = pnand %p879_p7, %p343_p8 }
  0x10   : > { %s881_s21 = sshll.u32 (!%p344_p9), %s1105_s13, 1  ;;  %v442_v0 = vlaneseq (!%p344_p9)  ;;  %v1031_v1 = vmov (!%p344_p9), 0.0   ;;  %p430_p11 = scmp.lt.s32.totalorder (!%p344_p9), %s1105_s13, 1  ;;  %v1032_v3 = vmov (!%p344_p9), 0   ;;  %v658_v23 = vld [vmem:[%s1247_s8] sm:$0xf] (!%p344_p9) }
  0x11   : > { %347 = sbr.rel (%p344_p9) target bundleno = 529 (0x211), region = 56  ;;  %p403_p10 = scmp.lt.s32.totalorder (!%p344_p9), %s881_s21, 3  ;;  %624 = vmatprep.mubr.f32.mxu0 (!%p344_p9), %v1031_v1  ;;  %732 = vmatprep.mubr.f32.mxu1 (!%p344_p9), %v1031_v1  ;;  %vm553_vm8 = vcmask (!%p344_p9), 1043456   ;;  %v512_v55 = vld [vmem:[%s1245_s6] sm:$0xff] (!%p344_p9)  ;;  %vm540_vm9 = vcmask (!%p344_p9), 31744   ;;  %v513_v56 = vld [vmem:[%s1245_s6 + $0x8] sm:$0xff] (!%p344_p9) }
  0x12   : > { %v443_v2 = vshrl.u32 (!%p344_p9), %v442_v0, 7  ;;  %954 = vset.pattern.permute.xlu0 (!%p344_p9), %v1032_v3  ;;  %955 = vset.pattern.permute.xlu1 (!%p344_p9), %v1032_v3  ;;  %s1253_s3 = sld [smem:[#allocation6_spill]] (!%p344_p9)  ;;  %v514_v57 = vld [vmem:[%s1245_s6 + $0x10] sm:$0xff] (!%p344_p9)  ;;  %v515_v58 = vld [vmem:[%s1245_s6 + $0x18] sm:$0xff] (!%p344_p9)  ;;  %vm664_vm10 = vcmask (!%p344_p9), 261120   ;;  %s904_s28 = sshll.u32 (!%p344_p9), %s1105_s13, 7 }
  0x14   : > { %v444_v4 = vsub.s32 (!%p344_p9), 0, %v443_v2  ;;  %v448_v5 = vsub.s32 (!%p344_p9), 1, %v443_v2 }
  0x18   : > { %s1260_s21 = smov (!%p403_p10, %s881_s21), 3 }
  0x19   : > { %s431_s22 = scalar_select %p430_p11, %s1105_s13, 1 }
  0x1a   : > { %s1137_s23 = sshll.u32 %s1260_s21, 2  ;;  %s423_s26 = scalar_lea.vmem %s1253_s3, %s1260_s21 }
  0x1b   : > { %s412_s29 = scalar_lea.vmem %s1240_s1, %s1137_s23  ;;  %v439_v6 = vld [vmem:[%s423_s26] sm:$0x3]  ;;  %s428_s17 = scalar_lea.vmem %s1243_s4, %s1260_s21 }
  0x1c   : > { %v437_v7 = vld [vmem:[%s412_s29] sm:$0xff]  ;;  %s903_s18 = sshll.u32 %s431_s22, 5  ;;  %v461_v12 = vrot.slane %v439_v6, %v444_v4  ;;  %v465_v13 = vrot.slane %v439_v6, %v448_v5  ;;  %s406_s27 = scalar_lea.vmem %s1239_s0, %s1137_s23 }
  0x1d   : > { %v440_v8 = vld [vmem:[%s428_s17] sm:$0x3]  ;;  %v453_v9 = vcombine.high %v437_v7, %v437_v7  ;;  %s434_s3 = scalar_lea.vmem %s1244_s5, %s903_s18  ;;  %s418_s29 = scalar_lea.vmem %s1241_s2, %s1137_s23 }
  0x1e   : > { %v445_v10 = vrot.slane %v440_v8, %v444_v4  ;;  %v449_v11 = vrot.slane %v440_v8, %v448_v5  ;;  %v516_v14 = vld [vmem:[%s434_s3] sm:$0xff]  ;;  %v518_v15 = vld [vmem:[%s434_s3 + $0x10] sm:$0xff]  ;;  %v517_v18 = vld [vmem:[%s434_s3 + $0x8] sm:$0xff]  ;;  %s1197_s17 = scalar_lea.hbm %s1248_s9, %s904_s28  ;;  %s1033_s13 = smov [#allocation2]  }
  0x1f   : > { %522 = vperm.xlu0 %954, %v516_v14   ;;  %532 = vperm.xlu1 %955, %v518_v15   ;;  %v519_v19 = vld [vmem:[%s434_s3 + $0x18] sm:$0xff]  ;;  %v436_v25 = vld [vmem:[%s406_s27] sm:$0xff]  ;;  %s399_s27 = sand.u32 1, %s1021_s10   ;;  %s971_s21 = sshll.u32 %s1033_s13, 4  ;;  %s972_s21 = int_to_ptr.vmem [resolvable:$false] %s971_s21 }
  0x20   : > { %v455_v16 = vmul.f32 %v445_v10, %v437_v7  ;;  %v456_v17 = vmul.f32 %v453_v9, %v449_v11  ;;  %v1163_v26 = vld [vmem:[%s418_s29] sm:$0xff]  ;;  %v485_v29 = vcombine.high %v436_v25, %v436_v25  ;;  %s880_s3 = sshll.u32 %s399_s27, 3  ;;  %s749_s24 = scalar_lea.sflag [#allocation3], %s399_s27 }
  0x21   : > { %v1167_v33 = vcombine.high %v1163_v26, %v1163_v26  ;;  %s401_s29 = scalar_lea.vmem [#allocation2], %s880_s3  ;;  %s973_s22 = scalar_lea.vmem %s972_s21, 256 }
  0x22   : > { %v468_v20 = vadd.f32 %v461_v12, %v455_v16  ;;  %v469_v21 = vadd.f32 %v465_v13, %v456_v17  ;;  %s763_s23 = sshll.u32 %s401_s29, 4  ;;  %s1199_s23 = int_to_ptr.vmem [resolvable:$true] %s763_s23 }
  0x23   : > { %527 = vperm.xlu0 %954, %v517_v18   ;;  %537 = vperm.xlu1 %955, %v519_v19   ;;  %s967_s25 = scalar_lea.vmem %s1199_s23, 128  ;;  %p974_p1 = scmp.lt.s32.totalorder %s1199_s23, %s972_s21 }
  0x24   : > { %959 = vrsqrt.f32 %v469_v21  ;;  %v490_v22 = vsub.f32 1.0, %v469_v21  ;;  %v489_v24 = vsub.f32 1.0, %v468_v20  ;;  %vm479_vm0 = vcmp.eq.f32.partialorder %v469_v21, inf  ;;  %p968_p12 = scmp.ne.s32.totalorder %s1199_s23, %s967_s25  ;;  %p975_p2 = scmp.lt.s32.totalorder %s973_s22, %s967_s25 }
  0x25   : > { %961 = vrsqrt.f32 %v468_v20  ;;  %v482_v28 = vand.u32 2147483648, %v469_v21  ;;  %vm481_vm1 = vcmp.eq.f32.partialorder %v469_v21, 0.0  ;;  %vm472_vm2 = vcmp.eq.f32.partialorder %v468_v20, inf }
  0x26   : > { %963 = vrsqrt.f32 %v490_v22  ;;  %v475_v32 = vand.u32 2147483648, %v468_v20  ;;  %vm500_vm3 = vcmp.eq.f32.partialorder %v490_v22, inf  ;;  %vm474_vm4 = vcmp.eq.f32.partialorder %v468_v20, 0.0  ;;  %p969_p13 = pnand %p968_p12, %p1122_p5  ;;  %p976_p3 = por %p975_p2, %p974_p1 }
  0x27   : > { %965 = vrsqrt.f32 %v489_v24  ;;  %661 = vperm.xlu0 %954, %v658_v23   ;;  %vm502_vm5 = vcmp.eq.f32.partialorder %v490_v22, 0.0  ;;  %v503_v37 = vand.u32 2147483648, %v490_v22  ;;  %vm493_vm6 = vcmp.eq.f32.partialorder %v489_v24, inf }
  0x28   : > { %v496_v42 = vand.u32 2147483648, %v489_v24  ;;  %vm495_vm7 = vcmp.eq.f32.partialorder %v489_v24, 0.0  ;;  %p970_p0 = pneg %p969_p13 }
  0x2a   : > { %p977_p4 = pnand %p976_p3, %p970_p0 }
  0x2e   : > { %v960_v27 = vpop.eup %959 }
  0x2f   : > { %v962_v30 = vpop.eup %961  ;;  %v478_v31 = vmul.f32 %v960_v27, %v469_v21 }
  0x30   : > { %v471_v34 = vmul.f32 %v962_v30, %v468_v20  ;;  %v964_v35 = vpop.eup %963 }
  0x31   : > { %v480_v36 = vsel %vm479_vm0, %v469_v21, %v478_v31  ;;  %v966_v38 = vpop.eup %965  ;;  %v499_v40 = vmul.f32 %v964_v35, %v490_v22 }
  0x32   : > { %v483_v39 = vsel %vm481_vm1, %v482_v28, %v480_v36  ;;  %v473_v41 = vsel %vm472_vm2, %v468_v20, %v471_v34  ;;  %v492_v44 = vmul.f32 %v966_v38, %v489_v24  ;;  %v657_v28 = vld [vmem:[%s1246_s7] sm:$0xf] }
  0x33   : > { %v476_v43 = vsel %vm474_vm4, %v475_v32, %v473_v41  ;;  %v488_v45 = vmul.f32 %v485_v29, %v483_v39  ;;  %v501_v46 = vsel %vm500_vm3, %v490_v22, %v499_v40 }
  0x34   : > { %v504_v47 = vsel %vm502_vm5, %v503_v37, %v501_v46  ;;  %v487_v48 = vmul.f32 %v476_v43, %v436_v25  ;;  %v494_v49 = vsel %vm493_vm6, %v489_v24, %v492_v44 }
  0x35   : > { %v509_v50 = vmul.f32 %v1167_v33, %v504_v47  ;;  %v497_v51 = vsel %vm495_vm7, %v496_v42, %v494_v49 }
  0x36   : > { %v508_v52 = vmul.f32 %v497_v51, %v1163_v26 }
  0x37   : > { %v511_v53 = vadd.f32 %v509_v50, %v488_v45 }
  0x38   : > { %v510_v54 = vadd.f32 %v508_v52, %v487_v48 }
  0x39   : > { %891 = vmatprep.subr.msk.mxu0 %vm553_vm8, %v511_v53 }
  0x3a   : > { %892 = vmatpush1.msk.msra.mxu0 %vm553_vm8, %v510_v54 }
  0x3b   : > { %893 = vmatmul.mubr.msk.f32.vlgmr.msra.gmra.mrb[0].mxu0 %vm540_vm9, %v512_v55 }
  0x3c   : > { %630 = vmatprep.mubr.f32.mxu0 %v1031_v1 }
  0x3f   : > { %894 = vmatmul.mubr.msk.f32.gmra.mrb[2].mxu0 %vm540_vm9, %v513_v56 }
  0x40   : > { %636 = vmatprep.mubr.f32.mxu0 %v1031_v1 }
  0x43   : > { %895 = vmatmul.mubr.msk.f32.gmra.mrb[4].mxu0 %vm540_vm9, %v514_v57 }
  0x44   : > { %642 = vmatprep.mubr.f32.mxu0 %v1031_v1 }
  0x47   : > { %896 = vmatmul.mubr.msk.f32.gmra.mrb[6].mxu0 %vm540_vm9, %v515_v58 }
  0x9e   : > { %v523_v59 = vpop.permute.xlu0 %522  ;;  %v533_v5 = vpop.permute.xlu1 %532 }
  0xa2   : > { %v528_v63 = vpop.permute.xlu0 %527  ;;  %v538_v15 = vpop.permute.xlu1 %537 }
  0xa6   : > { %v662_v29 = vpop.permute.xlu0 %661 }
 0x10e   : > { %v626_v60 = vpop.f32.mrb[0].mxu0 }
 0x10f   : > { %v628_v61 = vpop.f32.mrb[1].mxu0  ;;  %v627_v62 = vadd.f32 %v626_v60, %v523_v59 }
 0x110   : > { %v629_v0 = vadd.f32 %v628_v61, %v523_v59 }
 0x111   : > { %v649_v7 = vmax.f32 %v627_v62, 0.0 }
 0x112   : > { %v632_v2 = vpop.f32.mrb[2].mxu0  ;;  %v650_v9 = vmax.f32 %v629_v0, 0.0 }
 0x113   : > { %v633_v3 = vadd.f32 %v632_v2, %v528_v63  ;;  %v634_v4 = vpop.f32.mrb[3].mxu0 }
 0x114   : > { %v635_v6 = vadd.f32 %v634_v4, %v528_v63 }
 0x115   : > { %v651_v8 = vmax.f32 %v633_v3, 0.0 }
 0x116   : > { %v652_v1 = vmax.f32 %v635_v6, 0.0  ;;  %v638_v10 = vpop.f32.mrb[4].mxu0 }
 0x117   : > { %v640_v11 = vpop.f32.mrb[5].mxu0  ;;  %v907_v12 = vpack.c.bf16 %v651_v8, %v649_v7  ;;  %v639_v14 = vadd.f32 %v638_v10, %v533_v5 }
 0x118   : > { %v905_v13 = vpack.c.bf16 %v652_v1, %v650_v9  ;;  %v641_v16 = vadd.f32 %v640_v11, %v533_v5 }
 0x119   : > { %v653_v21 = vmax.f32 %v639_v14, 0.0 }
 0x11a   : > { %v644_v17 = vpop.f32.mrb[6].mxu0  ;;  %906 = vmatprep.subr.bf16.mxu1 %v905_v13  ;;  %v654_v23 = vmax.f32 %v641_v16, 0.0 }
 0x11b   : > { %v645_v18 = vadd.f32 %v644_v17, %v538_v15  ;;  %v646_v19 = vpop.f32.mrb[7].mxu0  ;;  %908 = vmatpush1.bf16.msra.mxu1 %v907_v12 }
 0x11c   : > { %v647_v20 = vadd.f32 %v646_v19, %v538_v15 }
 0x11d   : > { %v655_v22 = vmax.f32 %v645_v18, 0.0 }
 0x11e   : > { %v656_v24 = vmax.f32 %v647_v20, 0.0 }
 0x11f   : > { %v911_v25 = vpack.c.bf16 %v655_v22, %v653_v21 }
 0x120   : > { %v909_v27 = vpack.c.bf16 %v656_v24, %v654_v23 }
 0x122   : > { %910 = vmatprep.subr.bf16.mxu1 %v909_v27 }
 0x123   : > { %912 = vmatpush1.bf16.msra.mxu1 %v911_v25 }
 0x126   : > { %897 = vmatmul.mubr.msk.f32.vlgmr.msra.gmra.mrb[0].mxu1 %vm664_vm10, %v657_v28 }
 0x1f9   : > { %v734_v30 = vpop.f32.mrb[0].mxu1 }
 0x1fa   : > { %v735_v31 = vadd.f32 %v734_v30, %v662_v29  ;;  %v736_v32 = vpop.f32.mrb[1].mxu1 }
 0x1fb   : > { %v737_v34 = vadd.f32 %v736_v32, %v662_v29 }
 0x1fc   : > { %v739_v35 = vsub.f32 %v735_v31, %v1163_v26 }
 0x1fd   : > { %v740_v36 = vsub.f32 %v737_v34, %v1167_v33 }
 0x1fe   : > { %v741_v37 = vmul.f32 %v739_v35, %v739_v35 }
 0x1ff   : > { %v742_v38 = vmul.f32 %v740_v36, %v740_v36 }
 0x201   : > { %v745_v39 = vcombine.low %v741_v37, %v742_v38 }
 0x203   : > { %747 = vst [vmem:[%s401_s29] sm:$0xff] %v745_v39 }
 0x204   : > { %980 = shalt.err (!%p977_p4)
}
 0x205   : > { %s981_s18 = scalar_lea.hbm %s1197_s17, 128  ;;  %s985_s3 = scalar_lea.hbm %s1248_s9, 256 }
 0x206   : > { %p982_p7 = scmp.ne.s32.totalorder %s1197_s17, %s981_s18  ;;  %p986_p10 = scmp.lt.u32.totalorder %s1197_s17, %s1248_s9 }
 0x207   : > { %p987_p11 = scmp.lt.u32.totalorder %s985_s3, %s981_s18  ;;  %p989_p13 = scmp.lt.u32.totalorder %s981_s18, %s1197_s17 }
 0x208   : > { %p983_p8 = pnand %p982_p7, %p1122_p5 }
 0x209   : > { %p988_p12 = por %p987_p11, %p986_p10 }
 0x20a   : > { %p984_p9 = pneg %p983_p8 }
 0x20b   : > { %p990_p0 = por %p989_p13, %p988_p12 }
 0x20d   : > { %p991_p1 = pnand %p990_p0, %p984_p9 }
 0x20f   : > { %994 = shalt.err (!%p991_p1)
}
 0x210   : > { %913 = dma.vmem_to_hbm [thread:$0]  (%p1122_p5), %s1199_s23, 128, %s1197_s17, %s749_s24  }
 0x211 PF: > { %p919_p2 = scmp.ge.s32.totalorder %s1029_s12, 2  ;;  %s775_s14 = sand.u32 1, %s1017_s30  }
 0x212   : > { %s776_s16 = scalar_lea.sflag [#allocation3], %s775_s14 }
 0x213   : > { %p916_p3 = pnand %p919_p2, %p1126_p6 }
 0x215   : > { %1012 = dma.done.wait (!%p916_p3), %s776_s16, 128  }
 0x216   : > { %1014 = vsyncadd (!%p916_p3), %s776_s16, 4294967168  ;;  %s1254_s25 = sld [smem:[#allocation5_spill]]  ;;  %p19_p4 = scmp.ge.s32.totalorder %s1109_s15, 4  }
 0x217   : > { %s1255_s30 = smov %s1021_s10  ;;  %s1256_s10 = smov %s1025_s11 }
 0x218   : > { %s1258_s12 = smov %s1109_s15  ;;  %21 = sbr.rel (!%p19_p4) target bundleno = 5 (0x5), region = 106 }
 0x21c   : > { %s1257_s11 = smov %s1254_s25 }
 0x21f   :  { %781 = vsyncpa [#allocation3], 1 }
 0x220   :  { %783 = vsyncpa [#allocation3 + $0x1], 1 }

</bundles_post_ra>
